<compile_context>
chip_gen: v7x
topology: tpu7x:2x2x1
jax: 0.10.0
libtpu: 0.0.40
codegen_flags: <defaults>
</compile_context>

<pallas_src>
import functools

import jax
import jax.numpy as jnp
from jax.experimental import pallas as pl
from jax.experimental.pallas import tpu as pltpu

LANES = 128
MAX_TILE_ROWS = 1024   # (1024,128) f32 tile = 512 KiB; well under VMEM limits
NUM_CORES = 2          # shard rows over 2 TensorCores (no-op on 1-TC chips)


def _bcl_kernel(margin, rows, tile_rows, inner, need_mask,
                d_ref, l_ref, pos_ref, neg_ref, s1_ref, s2_ref):
    """Per-tile partial sums for the 4 reductions the loss needs."""
    i = pl.program_id(1)

    @pl.when(i == 0)
    def _():
        pos_ref[...] = jnp.zeros_like(pos_ref)
        neg_ref[...] = jnp.zeros_like(neg_ref)
        s1_ref[...] = jnp.zeros_like(s1_ref)
        s2_ref[...] = jnp.zeros_like(s2_ref)

    d = d_ref[...]                          # raw distance, f32 (tile_rows, 128)
    lab = l_ref[...].astype(jnp.int32)      # labels {0, 1, 255}, streamed as u8

    posm = lab == 0      # no-change -> remapped +1 -> counted in pos_num
    negm = lab == 1      # change    -> remapped -1 -> counted in neg_num
    ignm = lab == 255    # ignore

    pos_f = posm.astype(jnp.float32)
    neg_f = negm.astype(jnp.float32)
    ign_f = ignm.astype(jnp.float32)

    # loss_1 term: (1 + lab)/2 * d^2  ==  pos * d^2  (255-pixels have d masked
    # to 0, so their coefficient 128 never sees a nonzero distance).
    t1 = pos_f * d * d

    # loss_2 term: (1 - lab)/2 * clamp(margin - masked_d, 0)^2
    # coefficient: 1 for change, 0 for no-change, -127 for the 255 quirk.
    dm = jnp.where(ignm, 0.0, d)
    cl = jnp.maximum(margin - dm, 0.0)
    coef2 = neg_f - 127.0 * ign_f
    t2 = coef2 * cl * cl

    if need_mask:
        # Ragged / duplicated tail tiles: zero rows beyond the real extent.
        step = pl.program_id(0) * inner + i
        row = jax.lax.broadcasted_iota(jnp.int32, (tile_rows, LANES), 0)
        valid = step * tile_rows + row < rows
        vf = valid.astype(jnp.float32)
        pos_f = pos_f * vf
        neg_f = neg_f * vf
        t1 = jnp.where(valid, t1, 0.0)   # where-select: OOB garbage may be NaN
        t2 = jnp.where(valid, t2, 0.0)

    # (8, 128) accumulators: pure sublane-aligned VPU adds, no per-tile XLU.
    sub = tile_rows // 8
    pos_ref[...] += pos_f.reshape(sub, 8, LANES).sum(axis=0)
    neg_ref[...] += neg_f.reshape(sub, 8, LANES).sum(axis=0)
    s1_ref[...] += t1.reshape(sub, 8, LANES).sum(axis=0)
    s2_ref[...] += t2.reshape(sub, 8, LANES).sum(axis=0)


def bcl_loss(distance, label, margin=2.0, max_tile_rows=MAX_TILE_ROWS):
    """Pallas implementation of BCL.forward(distance, label)."""
    d = distance.reshape(-1).astype(jnp.float32)
    l = label.reshape(-1).astype(jnp.uint8)   # categorical {0,1,255}: 1 B/elem
    n = d.shape[0]

    # Pad (zeros) only up to a multiple of 8*128 so the (rows, 128) view has
    # sublane-aligned rows; this is a no-op (no copy) for typical B*H*W sizes.
    chunk = 8 * LANES
    n_p = pl.cdiv(n, chunk) * chunk
    pad = n_p - n
    if pad:
        d = jnp.pad(d, (0, pad))
        l = jnp.pad(l, (0, pad))
    rows = n_p // LANES
    d = d.reshape(rows, LANES)
    l = l.reshape(rows, LANES)

    max_tile_rows = max(32, (max_tile_rows // 32) * 32)  # u8 sublane tiling
    tile_rows = min(max_tile_rows, rows)                 # full-dim block if small
    n_blocks = pl.cdiv(rows, tile_rows)
    inner = pl.cdiv(n_blocks, NUM_CORES)
    need_mask = (NUM_CORES * inner * tile_rows) != rows
    last_block = n_blocks - 1

    def in_map(c, i):
        # Clamp so no DMA is ever issued past the real extent; clamped
        # duplicate tiles are zeroed by the in-kernel row mask.
        return (jnp.minimum(c * inner + i, last_block), 0)

    acc = jax.ShapeDtypeStruct((NUM_CORES, 8, LANES), jnp.float32)
    out_spec = pl.BlockSpec((None, 8, LANES), lambda c, i: (c, 0, 0))

    kernel = functools.partial(_bcl_kernel, float(margin), rows, tile_rows,
                               inner, need_mask)

    pos_a, neg_a, s1_a, s2_a = pl.pallas_call(
        kernel,
        out_shape=(acc, acc, acc, acc),
        grid_spec=pltpu.PrefetchScalarGridSpec(
            num_scalar_prefetch=0,
            grid=(NUM_CORES, inner),
            in_specs=[pl.BlockSpec((tile_rows, LANES), in_map),
                      pl.BlockSpec((tile_rows, LANES), in_map)],
            out_specs=[out_spec, out_spec, out_spec, out_spec],
        ),
        compiler_params=pltpu.CompilerParams(
            dimension_semantics=("parallel", "arbitrary")),
    )(d, l)

    # Zero-padded elements have label 0, so they only inflate pos_num by the
    # (static) pad count; everything else is pad-safe because padded d == 0.
    pos_num = jnp.sum(pos_a) - float(pad) + 0.0001
    neg_num = jnp.sum(neg_a) + 0.0001
    loss_1 = jnp.sum(s1_a) / pos_num
    loss_2 = jnp.sum(s2_a) / neg_num
    return loss_1 + loss_2


def bcl_loss_ref(distance, label, margin=2.0):
    """Pure-JAX reference mirroring the PyTorch forward exactly."""
    label = label.astype(jnp.float32)
    label = jnp.where(label == 1.0, -1.0, jnp.where(label == 0.0, 1.0, label))
    mask = (label != 255.0).astype(jnp.float32)
    distance = distance.astype(jnp.float32) * mask
    pos_num = jnp.sum((label == 1.0).astype(jnp.float32)) + 0.0001
    neg_num = jnp.sum((label == -1.0).astype(jnp.float32)) + 0.0001
    loss_1 = jnp.sum((1.0 + label) / 2.0 * distance ** 2) / pos_num
    loss_2 = jnp.sum((1.0 - label) / 2.0 *
                     jnp.maximum(margin - distance, 0.0) ** 2) / neg_num
    return loss_1 + loss_2


if __name__ == "__main__":
    key = jax.random.PRNGKey(0)
    k1, k2, k3, k4 = jax.random.split(key, 4)

    # Case 1: small (B, H, W) map; exercises the zero-pad path (n % 1024 != 0).
    B, H, W = 2, 16, 16
    distance = jax.random.uniform(k1, (B, H, W), jnp.float32) * 3.0
    raw = jax.random.randint(k2, (B, H, W), 0, 3)
    label = jnp.where(raw == 2, 255, raw).astype(jnp.float32)  # {0,1,255}

    loss = jax.block_until_ready(bcl_loss(distance, label, margin=2.0))
    ref = bcl_loss_ref(distance, label, margin=2.0)
    assert jnp.allclose(loss, ref, rtol=1e-4, atol=1e-4), (loss, ref)

    # Case 2: multi-tile grid with a ragged last tile and the 2-core split
    # (small shape, small max_tile_rows just to exercise those code paths).
    B2, H2, W2 = 3, 24, 128     # 9216 elems -> 72 rows of 128 (no padding)
    distance2 = jax.random.uniform(k3, (B2, H2, W2), jnp.float32) * 3.0
    raw2 = jax.random.randint(k4, (B2, H2, W2), 0, 3)
    label2 = jnp.where(raw2 == 2, 255, raw2).astype(jnp.float32)

    loss2 = jax.block_until_ready(
        bcl_loss(distance2, label2, margin=2.0, max_tile_rows=32))
    ref2 = bcl_loss_ref(distance2, label2, margin=2.0)
    assert jnp.allclose(loss2, ref2, rtol=1e-4, atol=1e-4), (loss2, ref2)

    print("KERNEL_OK")
</pallas_src>

<mosaic_0001>
module attributes {stable_mosaic.version = 11 : i64} {
  func.func @_bcl_kernel(%arg0: i32, %arg1: i32, %arg2: memref<8x128xf32, #tpu.memory_space<vmem>>, %arg3: memref<8x128xi8, #tpu.memory_space<vmem>>, %arg4: memref<1x8x128xf32, #tpu.memory_space<vmem>>, %arg5: memref<1x8x128xf32, #tpu.memory_space<vmem>>, %arg6: memref<1x8x128xf32, #tpu.memory_space<vmem>>, %arg7: memref<1x8x128xf32, #tpu.memory_space<vmem>>) attributes {dimension_semantics = [#tpu.dimension_semantics<parallel>, #tpu.dimension_semantics<arbitrary>], iteration_bounds = array<i64: 2, 1>, scalar_prefetch = 0 : i64, scratch_operands = 0 : i64, tpu.core_type = #tpu.core_type<tc>, window_params = [{transform_indices = @transform_0, window_bounds = array<i64: 8, 128>}, {transform_indices = @transform_1, window_bounds = array<i64: 8, 128>}, {transform_indices = @transform_2, window_bounds = array<i64: 1, 8, 128>}, {transform_indices = @transform_3, window_bounds = array<i64: 1, 8, 128>}, {transform_indices = @transform_4, window_bounds = array<i64: 1, 8, 128>}, {transform_indices = @transform_5, window_bounds = array<i64: 1, 8, 128>}]} {
    %c0_i32 = arith.constant 0 : i32
    %0 = arith.cmpi eq, %arg1, %c0_i32 : i32
    %1 = arith.extui %0 : i1 to i32
    %c0_i32_0 = arith.constant 0 : i32
    %2 = arith.cmpi ne, %1, %c0_i32_0 : i32
    scf.if %2 {
      %cst_40 = arith.constant 0.000000e+00 : f32
      %79 = vector.broadcast %cst_40 : f32 to vector<8x128xf32>
      %c0_41 = arith.constant 0 : index
      %c0_42 = arith.constant 0 : index
      %c0_43 = arith.constant 0 : index
      %80 = vector.load %arg4[%c0_41, %c0_42, %c0_43] : memref<1x8x128xf32, #tpu.memory_space<vmem>>, vector<1x8x128xf32>
      %81 = vector.shape_cast %80 : vector<1x8x128xf32> to vector<8x128xf32>
      %82 = vector.shape_cast %79 : vector<8x128xf32> to vector<1x8x128xf32>
      tpu.vector_store %arg4[%c0_41, %c0_42, %c0_43], %82 {strides = array<i32>} : memref<1x8x128xf32, #tpu.memory_space<vmem>>, vector<1x8x128xf32>,
      %cst_44 = arith.constant 0.000000e+00 : f32
      %83 = vector.broadcast %cst_44 : f32 to vector<8x128xf32>
      %c0_45 = arith.constant 0 : index
      %c0_46 = arith.constant 0 : index
      %c0_47 = arith.constant 0 : index
      %84 = vector.load %arg5[%c0_45, %c0_46, %c0_47] : memref<1x8x128xf32, #tpu.memory_space<vmem>>, vector<1x8x128xf32>
      %85 = vector.shape_cast %84 : vector<1x8x128xf32> to vector<8x128xf32>
      %86 = vector.shape_cast %83 : vector<8x128xf32> to vector<1x8x128xf32>
      tpu.vector_store %arg5[%c0_45, %c0_46, %c0_47], %86 {strides = array<i32>} : memref<1x8x128xf32, #tpu.memory_space<vmem>>, vector<1x8x128xf32>,
      %cst_48 = arith.constant 0.000000e+00 : f32
      %87 = vector.broadcast %cst_48 : f32 to vector<8x128xf32>
      %c0_49 = arith.constant 0 : index
      %c0_50 = arith.constant 0 : index
      %c0_51 = arith.constant 0 : index
      %88 = vector.load %arg6[%c0_49, %c0_50, %c0_51] : memref<1x8x128xf32, #tpu.memory_space<vmem>>, vector<1x8x128xf32>
      %89 = vector.shape_cast %88 : vector<1x8x128xf32> to vector<8x128xf32>
      %90 = vector.shape_cast %87 : vector<8x128xf32> to vector<1x8x128xf32>
      tpu.vector_store %arg6[%c0_49, %c0_50, %c0_51], %90 {strides = array<i32>} : memref<1x8x128xf32, #tpu.memory_space<vmem>>, vector<1x8x128xf32>,
      %cst_52 = arith.constant 0.000000e+00 : f32
      %91 = vector.broadcast %cst_52 : f32 to vector<8x128xf32>
      %c0_53 = arith.constant 0 : index
      %c0_54 = arith.constant 0 : index
      %c0_55 = arith.constant 0 : index
      %92 = vector.load %arg7[%c0_53, %c0_54, %c0_55] : memref<1x8x128xf32, #tpu.memory_space<vmem>>, vector<1x8x128xf32>
      %93 = vector.shape_cast %92 : vector<1x8x128xf32> to vector<8x128xf32>
      %94 = vector.shape_cast %91 : vector<8x128xf32> to vector<1x8x128xf32>
      tpu.vector_store %arg7[%c0_53, %c0_54, %c0_55], %94 {strides = array<i32>} : memref<1x8x128xf32, #tpu.memory_space<vmem>>, vector<1x8x128xf32>,
    } else {
    }
    %c0 = arith.constant 0 : index
    %c0_1 = arith.constant 0 : index
    %3 = vector.load %arg2[%c0, %c0_1] : memref<8x128xf32, #tpu.memory_space<vmem>>, vector<8x128xf32>
    %c0_2 = arith.constant 0 : index
    %c0_3 = arith.constant 0 : index
    %4 = vector.load %arg3[%c0_2, %c0_3] : memref<8x128xi8, #tpu.memory_space<vmem>>, vector<8x128xi8>
    %5 = arith.extui %4 : vector<8x128xi8> to vector<8x128xi32>
    %c0_i32_4 = arith.constant 0 : i32
    %6 = vector.broadcast %c0_i32_4 : i32 to vector<8x128xi32>
    %7 = arith.cmpi eq, %5, %6 : vector<8x128xi32>
    %c1_i32 = arith.constant 1 : i32
    %8 = vector.broadcast %c1_i32 : i32 to vector<8x128xi32>
    %9 = arith.cmpi eq, %5, %8 : vector<8x128xi32>
    %c255_i32 = arith.constant 255 : i32
    %10 = vector.broadcast %c255_i32 : i32 to vector<8x128xi32>
    %11 = arith.cmpi eq, %5, %10 : vector<8x128xi32>
    %12 = arith.extui %7 : vector<8x128xi1> to vector<8x128xi32>
    %13 = arith.sitofp %12 : vector<8x128xi32> to vector<8x128xf32>
    %14 = arith.extui %9 : vector<8x128xi1> to vector<8x128xi32>
    %15 = arith.sitofp %14 : vector<8x128xi32> to vector<8x128xf32>
    %16 = arith.extui %11 : vector<8x128xi1> to vector<8x128xi32>
    %17 = arith.sitofp %16 : vector<8x128xi32> to vector<8x128xf32>
    %18 = arith.mulf %13, %3 : vector<8x128xf32>
    %19 = arith.mulf %18, %3 : vector<8x128xf32>
    %cst = arith.constant 0.000000e+00 : f32
    %20 = vector.broadcast %cst : f32 to vector<8x128xf32>
    %21 = arith.select %11, %20, %3 : vector<8x128xi1>, vector<8x128xf32>
    %cst_5 = arith.constant 2.000000e+00 : f32
    %22 = vector.broadcast %cst_5 : f32 to vector<8x128xf32>
    %23 = arith.subf %22, %21 : vector<8x128xf32>
    %cst_6 = arith.constant 0.000000e+00 : f32
    %24 = vector.broadcast %cst_6 : f32 to vector<8x128xf32>
    %25 = arith.maximumf %23, %24 : vector<8x128xf32>
    %cst_7 = arith.constant 1.270000e+02 : f32
    %26 = vector.broadcast %cst_7 : f32 to vector<8x128xf32>
    %27 = arith.mulf %26, %17 : vector<8x128xf32>
    %28 = arith.subf %15, %27 : vector<8x128xf32>
    %29 = arith.mulf %28, %25 : vector<8x128xf32>
    %30 = arith.mulf %29, %25 : vector<8x128xf32>
    %c1_i32_8 = arith.constant 1 : i32
    %31 = arith.muli %arg0, %c1_i32_8 : i32
    %32 = arith.addi %31, %arg1 : i32
    %33 = tpu.iota {dimensions = array<i32: 0>} : vector<8x128xi32>
    %c8_i32 = arith.constant 8 : i32
    %34 = arith.muli %32, %c8_i32 : i32
    %35 = vector.broadcast %34 : i32 to vector<8x128xi32>
    %36 = arith.addi %35, %33 : vector<8x128xi32>
    %c8_i32_9 = arith.constant 8 : i32
    %37 = vector.broadcast %c8_i32_9 : i32 to vector<8x128xi32>
    %38 = arith.cmpi slt, %36, %37 : vector<8x128xi32>
    %39 = arith.extui %38 : vector<8x128xi1> to vector<8x128xi32>
    %40 = arith.sitofp %39 : vector<8x128xi32> to vector<8x128xf32>
    %41 = arith.mulf %13, %40 : vector<8x128xf32>
    %42 = arith.mulf %15, %40 : vector<8x128xf32>
    %cst_10 = arith.constant 0.000000e+00 : f32
    %43 = vector.broadcast %cst_10 : f32 to vector<8x128xf32>
    %44 = arith.select %38, %19, %43 : vector<8x128xi1>, vector<8x128xf32>
    %cst_11 = arith.constant 0.000000e+00 : f32
    %45 = vector.broadcast %cst_11 : f32 to vector<8x128xf32>
    %46 = arith.select %38, %30, %45 : vector<8x128xi1>, vector<8x128xf32>
    %c0_12 = arith.constant 0 : index
    %c0_13 = arith.constant 0 : index
    %c0_14 = arith.constant 0 : index
    %47 = vector.load %arg4[%c0_12, %c0_13, %c0_14] : memref<1x8x128xf32, #tpu.memory_space<vmem>>, vector<1x8x128xf32>
    %48 = vector.shape_cast %47 : vector<1x8x128xf32> to vector<8x128xf32>
    %49 = vector.shape_cast %41 : vector<8x128xf32> to vector<1x8x128xf32>
    %cst_15 = arith.constant dense<0.000000e+00> : vector<8x128xf32>
    %50 = vector.multi_reduction <add>, %49, %cst_15 [0] : vector<1x8x128xf32> to vector<8x128xf32>
    %51 = arith.addf %48, %50 : vector<8x128xf32>
    %c0_16 = arith.constant 0 : index
    %c0_17 = arith.constant 0 : index
    %c0_18 = arith.constant 0 : index
    %52 = vector.load %arg4[%c0_16, %c0_17, %c0_18] : memref<1x8x128xf32, #tpu.memory_space<vmem>>, vector<1x8x128xf32>
    %53 = vector.shape_cast %52 : vector<1x8x128xf32> to vector<8x128xf32>
    %54 = vector.shape_cast %51 : vector<8x128xf32> to vector<1x8x128xf32>
    tpu.vector_store %arg4[%c0_16, %c0_17, %c0_18], %54 {strides = array<i32>} : memref<1x8x128xf32, #tpu.memory_space<vmem>>, vector<1x8x128xf32>,
    %c0_19 = arith.constant 0 : index
    %c0_20 = arith.constant 0 : index
    %c0_21 = arith.constant 0 : index
    %55 = vector.load %arg5[%c0_19, %c0_20, %c0_21] : memref<1x8x128xf32, #tpu.memory_space<vmem>>, vector<1x8x128xf32>
    %56 = vector.shape_cast %55 : vector<1x8x128xf32> to vector<8x128xf32>
    %57 = vector.shape_cast %42 : vector<8x128xf32> to vector<1x8x128xf32>
    %cst_22 = arith.constant dense<0.000000e+00> : vector<8x128xf32>
    %58 = vector.multi_reduction <add>, %57, %cst_22 [0] : vector<1x8x128xf32> to vector<8x128xf32>
    %59 = arith.addf %56, %58 : vector<8x128xf32>
    %c0_23 = arith.constant 0 : index
    %c0_24 = arith.constant 0 : index
    %c0_25 = arith.constant 0 : index
    %60 = vector.load %arg5[%c0_23, %c0_24, %c0_25] : memref<1x8x128xf32, #tpu.memory_space<vmem>>, vector<1x8x128xf32>
    %61 = vector.shape_cast %60 : vector<1x8x128xf32> to vector<8x128xf32>
    %62 = vector.shape_cast %59 : vector<8x128xf32> to vector<1x8x128xf32>
    tpu.vector_store %arg5[%c0_23, %c0_24, %c0_25], %62 {strides = array<i32>} : memref<1x8x128xf32, #tpu.memory_space<vmem>>, vector<1x8x128xf32>,
    %c0_26 = arith.constant 0 : index
    %c0_27 = arith.constant 0 : index
    %c0_28 = arith.constant 0 : index
    %63 = vector.load %arg6[%c0_26, %c0_27, %c0_28] : memref<1x8x128xf32, #tpu.memory_space<vmem>>, vector<1x8x128xf32>
    %64 = vector.shape_cast %63 : vector<1x8x128xf32> to vector<8x128xf32>
    %65 = vector.shape_cast %44 : vector<8x128xf32> to vector<1x8x128xf32>
    %cst_29 = arith.constant dense<0.000000e+00> : vector<8x128xf32>
    %66 = vector.multi_reduction <add>, %65, %cst_29 [0] : vector<1x8x128xf32> to vector<8x128xf32>
    %67 = arith.addf %64, %66 : vector<8x128xf32>
    %c0_30 = arith.constant 0 : index
    %c0_31 = arith.constant 0 : index
    %c0_32 = arith.constant 0 : index
    %68 = vector.load %arg6[%c0_30, %c0_31, %c0_32] : memref<1x8x128xf32, #tpu.memory_space<vmem>>, vector<1x8x128xf32>
    %69 = vector.shape_cast %68 : vector<1x8x128xf32> to vector<8x128xf32>
    %70 = vector.shape_cast %67 : vector<8x128xf32> to vector<1x8x128xf32>
    tpu.vector_store %arg6[%c0_30, %c0_31, %c0_32], %70 {strides = array<i32>} : memref<1x8x128xf32, #tpu.memory_space<vmem>>, vector<1x8x128xf32>,
    %c0_33 = arith.constant 0 : index
    %c0_34 = arith.constant 0 : index
    %c0_35 = arith.constant 0 : index
    %71 = vector.load %arg7[%c0_33, %c0_34, %c0_35] : memref<1x8x128xf32, #tpu.memory_space<vmem>>, vector<1x8x128xf32>
    %72 = vector.shape_cast %71 : vector<1x8x128xf32> to vector<8x128xf32>
    %73 = vector.shape_cast %46 : vector<8x128xf32> to vector<1x8x128xf32>
    %cst_36 = arith.constant dense<0.000000e+00> : vector<8x128xf32>
    %74 = vector.multi_reduction <add>, %73, %cst_36 [0] : vector<1x8x128xf32> to vector<8x128xf32>
    %75 = arith.addf %72, %74 : vector<8x128xf32>
    %c0_37 = arith.constant 0 : index
    %c0_38 = arith.constant 0 : index
    %c0_39 = arith.constant 0 : index
    %76 = vector.load %arg7[%c0_37, %c0_38, %c0_39] : memref<1x8x128xf32, #tpu.memory_space<vmem>>, vector<1x8x128xf32>
    %77 = vector.shape_cast %76 : vector<1x8x128xf32> to vector<8x128xf32>
    %78 = vector.shape_cast %75 : vector<8x128xf32> to vector<1x8x128xf32>
    tpu.vector_store %arg7[%c0_37, %c0_38, %c0_39], %78 {strides = array<i32>} : memref<1x8x128xf32, #tpu.memory_space<vmem>>, vector<1x8x128xf32>,
    return
  }
  func.func @transform_0(%arg0: i32, %arg1: i32) -> (i32, i32) {
    %c1_i32 = arith.constant 1 : i32
    %0 = arith.muli %arg0, %c1_i32 : i32
    %1 = arith.addi %0, %arg1 : i32
    %c0_i32 = arith.constant 0 : i32
    %2 = arith.minsi %1, %c0_i32 : i32
    %c0_i32_0 = arith.constant 0 : i32
    %c0_i32_1 = arith.constant 0 : i32
    return %2, %c0_i32_0 : i32, i32
  }
  func.func @transform_1(%arg0: i32, %arg1: i32) -> (i32, i32) {
    %c1_i32 = arith.constant 1 : i32
    %0 = arith.muli %arg0, %c1_i32 : i32
    %1 = arith.addi %0, %arg1 : i32
    %c0_i32 = arith.constant 0 : i32
    %2 = arith.minsi %1, %c0_i32 : i32
    %c0_i32_0 = arith.constant 0 : i32
    %c0_i32_1 = arith.constant 0 : i32
    return %2, %c0_i32_0 : i32, i32
  }
  func.func @transform_2(%arg0: i32, %arg1: i32) -> (i32, i32, i32) {
    %c0_i32 = arith.constant 0 : i32
    %c0_i32_0 = arith.constant 0 : i32
    %c0_i32_1 = arith.constant 0 : i32
    return %arg0, %c0_i32, %c0_i32_0 : i32, i32, i32
  }
  func.func @transform_3(%arg0: i32, %arg1: i32) -> (i32, i32, i32) {
    %c0_i32 = arith.constant 0 : i32
    %c0_i32_0 = arith.constant 0 : i32
    %c0_i32_1 = arith.constant 0 : i32
    return %arg0, %c0_i32, %c0_i32_0 : i32, i32, i32
  }
  func.func @transform_4(%arg0: i32, %arg1: i32) -> (i32, i32, i32) {
    %c0_i32 = arith.constant 0 : i32
    %c0_i32_0 = arith.constant 0 : i32
    %c0_i32_1 = arith.constant 0 : i32
    return %arg0, %c0_i32, %c0_i32_0 : i32, i32, i32
  }
  func.func @transform_5(%arg0: i32, %arg1: i32) -> (i32, i32, i32) {
    %c0_i32 = arith.constant 0 : i32
    %c0_i32_0 = arith.constant 0 : i32
    %c0_i32_1 = arith.constant 0 : i32
    return %arg0, %c0_i32, %c0_i32_0 : i32, i32, i32
  }
}

</mosaic_0001>

<bundles_post_ra>
// kernel: tpu_custom_call.1
= control target key start
LH: loop header
LB: loop body
LE: loop exit
PB: predicated region body
PF: predicated region fallthrough
CT: control target
= control target key end

     0   :  { %s1347_s0 = inlined_call_operand.hbm [shape: f32[8,128], index: 0, kind: input, shape index: {}]   ;;  %s1348_s1 = inlined_call_operand.vmem [shape: u8[8,128], index: 1, kind: input, shape index: {}]   ;;  %s1349_s2 = inlined_call_operand.hbm [shape: f32[2,8,128], index: 2, kind: output, shape index: {0}]   ;;  %s1350_s3 = inlined_call_operand.hbm [shape: f32[2,8,128], index: 3, kind: output, shape index: {1}]   ;;  %s1351_s4 = inlined_call_operand.hbm [shape: f32[2,8,128], index: 4, kind: output, shape index: {2}]   ;;  %s1352_s5 = inlined_call_operand.hbm [shape: f32[2,8,128], index: 5, kind: output, shape index: {3}]  }
   0x1   :  { %1359 = sst [smem:[#allocation16_spill]] %s1347_s0 }
   0x2   :  { %1360 = sst [smem:[#allocation17_spill]] %s1348_s1 }
   0x3   :  { %11 = vsyncpa [#allocation3], 0 }
   0x4   :  { %13 = vsyncpa [#allocation3 + $0x1], 0 }
   0x5   :  { %14 = vsyncpa [#allocation4], 0 }
   0x6   :  { %16 = vsyncpa [#allocation4 + $0x1], 0 }
   0x7   :  { %17 = vsyncpa [#allocation7], 0 }
   0x8   :  { %19 = vsyncpa [#allocation7 + $0x1], 0 }
   0x9   :  { %20 = vsyncpa [#allocation10], 0 }
   0xa   :  { %22 = vsyncpa [#allocation10 + $0x1], 0  ;;  %s1036_s18 = smov 0   ;;  %s1038_s19 = smov 0  }
   0xb   :  { %s1040_s20 = smov 0   ;;  %s1042_s21 = smov 0  }
   0xc   :  { %s1044_s22 = smov 0   ;;  %s1046_s23 = smov 0  }
   0xd   :  { %s1048_s24 = smov 0   ;;  %s1050_s25 = smov 0  }
   0xe LB: > { %s1075_s26 = sadd.s32 4294967295, %s998_s25   ;;  %s1356_s27 = sadd.s32 4294967294, %s998_s25   ;;  %s998_s25 = sphi %s1050_s25, %s28_s25   ;;  %s994_s24 = sphi %s1048_s24, %s1385_s24   ;;  %s990_s23 = sphi %s1046_s23, %s1384_s23   ;;  %s986_s22 = sphi %s1044_s22, %s1337_s22   ;;  %s982_s21 = sphi %s1042_s21, %s1383_s21   ;;  %s978_s20 = sphi %s1040_s20, %s1382_s20   ;;  %s974_s19 = sphi %s1038_s19, %s1381_s19   ;;  %s970_s18 = sphi %s1036_s18, %s1380_s18  }
   0xf   : > { %s40_s28 = sadd.s32 1, %s994_s24  ;;  %p967_p1 = scmp.ne.s32.totalorder %s986_s22, 0 }
  0x10   : > { %p42_p0 = scmp.ge.s32.totalorder %s40_s28, 2  ;;  %p61_p2 = scmp.eq.s32.totalorder %s998_s25, 0 }
  0x11   : > { %p66_p3 = scmp.ne.s32.totalorder %s986_s22, %s982_s21  ;;  %p67_p5 = scmp.eq.s32.totalorder %s1075_s26, 0 }
  0x12   : > { %s1387_s28 = smov (%p42_p0, %s40_s28), 0  ;;  %p1084_p4 = por %p967_p1, %p61_p2 }
  0x13   : > { %1361 = sst [smem:[#allocation15_spill]] %s1387_s28  ;;  %p1089_p6 = por %p67_p5, %p66_p3 }
  0x14   : > { %s108_s6 = ssub.s32 %s994_s24, %s1387_s28  ;;  %s111_s7 = sadd.s32 1, %s978_s20 }
  0x15   : > { %s1363_s30 = scalar_select %p1089_p6, 1, 0 }
  0x16   : > { %p109_p7 = scmp.eq.s32.totalorder %s108_s6, 0  ;;  %p121_p8 = scmp.ne.s32.totalorder %s978_s20, %s974_s19 }
  0x17   : > { %p122_p9 = scmp.eq.s32.totalorder %s1075_s26, 1  ;;  %p127_p10 = scmp.ne.s32.totalorder %s974_s19, %s970_s18 }
  0x18   : > { %s1097_s8 = scalar_select %p109_p7, %s978_s20, %s111_s7  }
  0x19   : > { %p128_p11 = scmp.eq.s32.totalorder %s1356_s27, 1  ;;  %p1106_p12 = por %p122_p9, %p121_p8 }
  0x1a   : > { %p698_p1 = scmp.lt.s32.totalorder %s998_s25, 2  ;;  %s1000_s11 = smov [#allocation2]  }
  0x1b   : > { %s1364_s9 = scalar_select %p1106_p12, 1, 0 }
  0x1c   : > { %p1111_p0 = por %p128_p11, %p127_p10  ;;  %s240_s12 = sshll.u32 %s1000_s11, 4  ;;  %s241_s12 = int_to_ptr.vmem [resolvable:$true] %s240_s12 }
  0x1d   : > { %p1118_p2 = pnand %p698_p1, %p1084_p4  ;;  %s1367_s0 = sld [smem:[#allocation16_spill]] }
  0x1e   : > { %s1365_s10 = scalar_select %p1111_p0, 1, 0 }
  0x1f   : > { %s1366_s13 = scalar_select %p1118_p2, 1, 0 }
  0x20   : > { %p775_p8 = pneg %p1118_p2 }
  0x23   : > { %s773_s16 = scalar_lea.hbm %s1367_s0, 128 }
  0x24   : > { %p774_p7 = scmp.ne.s32.totalorder %s1367_s0, %s773_s16  ;;  %p780_p4 = scmp.lt.u32.totalorder %s773_s16, %s773_s16 }
  0x25   : > { %p782_p11 = scmp.lt.u32.totalorder %s773_s16, %s1367_s0 }
  0x26   : > { %p776_p9 = pnand %p775_p8, %p774_p7 }
  0x27   : > { %p783_p1 = por %p782_p11, %p780_p4 }
  0x28   : > { %p777_p10 = pneg %p776_p9 }
  0x2a   : > { %p784_p13 = pnand %p783_p1, %p777_p10 }
  0x2c   : > { %787 = shalt.err (!%p784_p13)
}
  0x2d   : > { %s788_s7 = scalar_lea.vmem %s241_s12, 128  ;;  %s795_s11 = scalar_lea.vmem %s241_s12, 256 }
  0x2e   : > { %p789_p3 = scmp.ne.s32.totalorder %s241_s12, %s788_s7  ;;  %p796_p12 = scmp.lt.s32.totalorder %s241_s12, %s241_s12 }
  0x2f   : > { %p797_p6 = scmp.lt.s32.totalorder %s795_s11, %s788_s7 }
  0x30   : > { %p791_p5 = pnand %p789_p3, %p775_p8 }
  0x31   : > { %p798_p2 = por %p797_p6, %p796_p12 }
  0x32   : > { %p792_p0 = pneg %p791_p5 }
  0x34   : > { %p799_p7 = pnand %p798_p2, %p792_p0 }
  0x36   : > { %802 = shalt.err (!%p799_p7)
}
  0x37   : > { %p1368_p9 = scmp.ne.s32.totalorder %s1366_s13, 0  ;;  %p1369_p10 = scmp.lt.s32.totalorder %s998_s25, 3 }
  0x38   : > { %p1370_p13 = scmp.ge.s32.totalorder %s998_s25, 1 }
  0x39   : > { %684 = dma.hbm_to_vmem [thread:$0]  (!%p1368_p9), %s1367_s0, 128, %s241_s12, [#allocation3]  }
  0x3a   : > { %p259_p4 = pnand %p1370_p13, %p1369_p10 }
  0x3b   : > { %s264_s16 = sand.u32 (!%p259_p4), 1, %s986_s22   ;;  %p1371_p6 = scmp.ne.s32.totalorder (!%p259_p4), %s1363_s30, 0 }
  0x3c   : > { %262 = sbr.rel (%p259_p4) target bundleno = 177 (0xb1), region = 28  ;;  %s647_s17 = sshll.u32 (!%p259_p4), %s264_s16, 3 }
  0x3d   : > { %s265_s21 = scalar_lea.sflag (!%p259_p4), [#allocation3], %s264_s16  ;;  %s268_s29 = scalar_lea.vmem (!%p259_p4), [#allocation2], %s647_s17 }
  0x43   : > { %952 = dma.done.wait (%p1371_p6), %s265_s21, 128  }
  0x44   : > { %954 = vsyncadd (%p1371_p6), %s265_s21, 4294967168  ;;  %v361_v0 = vlaneseq  ;;  %p321_p12 = scmp.lt.s32.totalorder %s990_s23, 0  ;;  %s659_s12 = sshll.u32 %s990_s23, 3  ;;  %v338_v7 = vld [vmem:[%s268_s29] sm:$0xff]  ;;  %v1001_v8 = vmov 0.0  }
  0x45   : > { %v364_v2 = vstv %s659_s12  ;;  %s1153_s6 = sand.u32 1, %s974_s19   ;;  %s1372_s1 = sld [smem:[#allocation17_spill]] }
  0x46   : > { %v362_v1 = vshrl.u32 %v361_v0, 7  ;;  %s322_s13 = scalar_select %p321_p12, %s990_s23, 0 }
  0x47   : > { %s1161_s15 = sshll.u32 %s1153_s6, 3  ;;  %s1168_s17 = sshll.u32 %s990_s23, 7 }
  0x48   : > { %s1389_s13 = smov (!%p321_p12, %s322_s13), 0  ;;  %v1155_v3 = vadd.s32 %v364_v2, %v362_v1  ;;  %s302_s21 = scalar_lea.vmem [#allocation6], %s1161_s15 }
  0x49   : > { %s655_s30 = sshll.u32 %s1389_s13, 1  ;;  %s431_s12 = sshll.u32 %s302_s21, 4  ;;  %s1181_s12 = int_to_ptr.vmem [resolvable:$true] %s431_s12 }
  0x4a   : > { %vm366_vm0 = vcmp.lt.s32.totalorder %v1155_v3, 8  ;;  %s1357_s29 = scalar_lea.vmem [#allocation8], %s1161_s15  ;;  %s1189_s16 = scalar_lea.hbm %s1349_s2, %s1168_s17 }
  0x4b   : > { %s326_s14 = scalar_lea.vmem %s1372_s1, %s655_s30  ;;  %v660_v9 = vsel %vm366_vm0, 1.0, %v1001_v8  ;;  %s444_s13 = sshll.u32 %s1357_s29, 4  ;;  %s1193_s13 = int_to_ptr.vmem [resolvable:$true] %s444_s13 }
  0x4c   : > { %v339_v4 = vld [vmem:[%s326_s14] sm:$0x3]  ;;  %s295_s30 = scalar_lea.vmem [#allocation5], %s1161_s15  ;;  %s1179_s14 = scalar_lea.hbm %s1350_s3, %s1168_s17 }
  0x4d   : > { %v340_v5 = vunpack.c.0.s8 %v339_v4  ;;  %s418_s23 = sshll.u32 %s295_s30, 4  ;;  %s1201_s0 = scalar_lea.hbm %s1351_s4, %s1168_s17  ;;  %s1191_s23 = int_to_ptr.vmem [resolvable:$true] %s418_s23 }
  0x4e   : > { %s1373_s27 = sand.u32 1, %s1075_s26   ;;  %s803_s1 = scalar_lea.vmem %s1181_s12, 128 }
  0x4f   : > { %v341_v6 = vand.u32 255, %v340_v5  ;;  %s1206_s29 = scalar_lea.sflag [#allocation7], %s1373_s27  ;;  %p804_p0 = scmp.ne.s32.totalorder %s1181_s12, %s803_s1 }
  0x50   : > { %p1374_p2 = scmp.ne.s32.totalorder %s1364_s9, 0 }
  0x51   : > { %vm343_vm1 = vcmp.eq.s32.totalorder %v341_v6, 1  ;;  %vm344_vm2 = vcmp.eq.s32.totalorder %v341_v6, 255  ;;  %vm342_vm3 = vcmp.eq.s32.totalorder %v341_v6, 0 }
  0x52   : > { %v657_v10 = vsel %vm343_vm1, 1.0, %v1001_v8  ;;  %v658_v11 = vsel %vm344_vm2, 1.0, %v1001_v8  ;;  %v656_v12 = vsel %vm342_vm3, 1.0, %v1001_v8  ;;  %v353_v13 = vsel %vm344_vm2, 0.0, %v338_v7  ;;  %p805_p3 = pnand %p804_p0, %p1374_p2 }
  0x53   : > { %v356_v14 = vmul.f32 127.0, %v658_v11  ;;  %v370_v15 = vmul.f32 %v660_v9, %v657_v10  ;;  %v351_v16 = vmul.f32 %v656_v12, %v338_v7  ;;  %v369_v17 = vmul.f32 %v660_v9, %v656_v12 }
  0x54   : > { %v354_v18 = vsub.f32 2.0, %v353_v13  ;;  %p806_p5 = pneg %p805_p3 }
  0x55   : > { %v357_v19 = vsub.f32 %v657_v10, %v356_v14  ;;  %v352_v20 = vmul.f32 %v351_v16, %v338_v7  ;;  %380 = vst [vmem:[%s302_s21] sm:$0xff] %v370_v15  ;;  %376 = vst [vmem:[%s295_s30] sm:$0xff] %v369_v17  ;;  %s1002_s21 = smov [#allocation6]  }
  0x56   : > { %v1183_v21 = vmax.f32 %v354_v18, 0.0  ;;  %s807_s30 = sshll.u32 %s1002_s21, 4  ;;  %s808_s30 = int_to_ptr.vmem [resolvable:$false] %s807_s30 }
  0x57   : > { %v371_v22 = vsel %vm366_vm0, %v352_v20, 0.0  ;;  %s809_s28 = scalar_lea.vmem %s808_s30, 256  ;;  %p810_p8 = scmp.lt.s32.totalorder %s1181_s12, %s808_s30 }
  0x58   : > { %v358_v23 = vmul.f32 %v357_v19, %v1183_v21  ;;  %p811_p11 = scmp.lt.s32.totalorder %s809_s28, %s803_s1 }
  0x5a   : > { %p812_p1 = por %p811_p11, %p810_p8 }
  0x5c   : > { %p813_p7 = pnand %p812_p1, %p806_p5 }
  0x5e   : > { %816 = shalt.err (!%p813_p7)
}
  0x5f   : > { %s817_s26 = scalar_lea.hbm %s1179_s14, 128  ;;  %s821_s27 = scalar_lea.hbm %s1350_s3, 256 }
  0x60   : > { %p818_p9 = scmp.ne.s32.totalorder %s1179_s14, %s817_s26  ;;  %p822_p4 = scmp.lt.u32.totalorder %s1179_s14, %s1350_s3 }
  0x61   : > { %p823_p6 = scmp.lt.u32.totalorder %s821_s27, %s817_s26  ;;  %p825_p0 = scmp.lt.u32.totalorder %s817_s26, %s1179_s14 }
  0x62   : > { %p819_p10 = pnand %p818_p9, %p1374_p2 }
  0x63   : > { %p824_p12 = por %p823_p6, %p822_p4 }
  0x64   : > { %p820_p13 = pneg %p819_p10 }
  0x65   : > { %p826_p3 = por %p825_p0, %p824_p12 }
  0x67   : > { %p827_p5 = pnand %p826_p3, %p820_p13 }
  0x69   : > { %830 = shalt.err (!%p827_p5)
}
  0x6a   : > { %674 = dma.vmem_to_hbm [thread:$0]  (%p1374_p2), %s1181_s12, 128, %s1179_s14, %s1206_s29  }
  0x6b   : > { %s390_s1 = scalar_lea.sflag [#allocation4], %s1153_s6  ;;  %s831_s28 = scalar_lea.vmem %s1191_s23, 128 }
  0x6c   : > { %p832_p8 = scmp.ne.s32.totalorder %s1191_s23, %s831_s28  ;;  %s1003_s26 = smov [#allocation5]  }
  0x6d   : > { %s835_s7 = sshll.u32 %s1003_s26, 4  ;;  %s836_s7 = int_to_ptr.vmem [resolvable:$false] %s835_s7 }
  0x6e   : > { %p833_p11 = pnand %p832_p8, %p1374_p2  ;;  %s837_s11 = scalar_lea.vmem %s836_s7, 256 }
  0x6f   : > { %p838_p7 = scmp.lt.s32.totalorder %s1191_s23, %s836_s7  ;;  %p839_p9 = scmp.lt.s32.totalorder %s837_s11, %s831_s28 }
  0x70   : > { %p834_p1 = pneg %p833_p11 }
  0x71   : > { %p840_p10 = por %p839_p9, %p838_p7 }
  0x73   : > { %p841_p13 = pnand %p840_p10, %p834_p1 }
  0x75   : > { %844 = shalt.err (!%p841_p13)
}
  0x76   : > { %s845_s12 = scalar_lea.hbm %s1189_s16, 128  ;;  %s849_s21 = scalar_lea.hbm %s1349_s2, 256 }
  0x77   : > { %p846_p4 = scmp.ne.s32.totalorder %s1189_s16, %s845_s12  ;;  %p850_p0 = scmp.lt.u32.totalorder %s1189_s16, %s1349_s2 }
  0x78   : > { %p851_p3 = scmp.lt.u32.totalorder %s849_s21, %s845_s12  ;;  %p853_p8 = scmp.lt.u32.totalorder %s845_s12, %s1189_s16 }
  0x79   : > { %p847_p6 = pnand %p846_p4, %p1374_p2 }
  0x7a   : > { %p852_p5 = por %p851_p3, %p850_p0 }
  0x7b   : > { %p848_p12 = pneg %p847_p6 }
  0x7c   : > { %p854_p11 = por %p853_p8, %p852_p5 }
  0x7e   : > { %p855_p1 = pnand %p854_p11, %p848_p12 }
  0x80   : > { %858 = shalt.err (!%p855_p1)
}
  0x81   : > { %673 = dma.vmem_to_hbm [thread:$0]  (%p1374_p2), %s1191_s23, 128, %s1189_s16, %s390_s1   ;;  %v359_v24 = vmul.f32 %v358_v23, %v1183_v21 }
  0x82   : > { %s1375_s28 = scalar_lea.vmem [#allocation8], %s1161_s15  ;;  %s316_s7 = scalar_lea.vmem [#allocation9], %s1161_s15 }
  0x83   : > { %384 = vst [vmem:[%s1375_s28] sm:$0xff] %v371_v22  ;;  %s1258_s11 = sshll.u32 %s316_s7, 4  ;;  %s859_s12 = scalar_lea.vmem %s1193_s13, 128  ;;  %s1291_s11 = int_to_ptr.vmem [resolvable:$true] %s1258_s11 }
  0x84   : > { %p860_p7 = scmp.ne.s32.totalorder %s1193_s13, %s859_s12  ;;  %s1004_s14 = smov [#allocation8]  }
  0x85   : > { %s863_s27 = sshll.u32 %s1004_s14, 4  ;;  %s864_s27 = int_to_ptr.vmem [resolvable:$false] %s863_s27 }
  0x86   : > { %p861_p9 = pnand %p860_p7, %p1374_p2  ;;  %s865_s21 = scalar_lea.vmem %s864_s27, 256 }
  0x87   : > { %p866_p13 = scmp.lt.s32.totalorder %s1193_s13, %s864_s27  ;;  %p867_p4 = scmp.lt.s32.totalorder %s865_s21, %s859_s12 }
  0x88   : > { %p862_p10 = pneg %p861_p9 }
  0x89   : > { %p868_p6 = por %p867_p4, %p866_p13 }
  0x8b   : > { %p869_p12 = pnand %p868_p6, %p862_p10 }
  0x8d   : > { %872 = shalt.err (!%p869_p12)
}
  0x8e   : > { %s873_s16 = scalar_lea.hbm %s1201_s0, 128  ;;  %s877_s30 = scalar_lea.hbm %s1351_s4, 256 }
  0x8f   : > { %p874_p0 = scmp.ne.s32.totalorder %s1201_s0, %s873_s16  ;;  %p878_p8 = scmp.lt.u32.totalorder %s1201_s0, %s1351_s4 }
  0x90   : > { %p879_p11 = scmp.lt.u32.totalorder %s877_s30, %s873_s16  ;;  %p881_p7 = scmp.lt.u32.totalorder %s873_s16, %s1201_s0 }
  0x91   : > { %p875_p3 = pnand %p874_p0, %p1374_p2 }
  0x92   : > { %p880_p1 = por %p879_p11, %p878_p8 }
  0x93   : > { %p876_p5 = pneg %p875_p3 }
  0x94   : > { %p882_p9 = por %p881_p7, %p880_p1 }
  0x96   : > { %p883_p10 = pnand %p882_p9, %p876_p5 }
  0x98   : > { %886 = shalt.err (!%p883_p10)
}
  0x99   : > { %675 = dma.vmem_to_hbm [thread:$0]  (%p1374_p2), %s1193_s13, 128, %s1201_s0, %s1206_s29   ;;  %v372_v25 = vsel %vm366_vm0, %v359_v24, 0.0 }
  0x9a   : > { %s1288_s27 = scalar_lea.hbm %s1352_s5, %s1168_s17  ;;  %388 = vst [vmem:[%s316_s7] sm:$0xff] %v372_v25  ;;  %s405_s21 = scalar_lea.sflag [#allocation10], %s1153_s6 }
  0x9b   : > { %s887_s16 = scalar_lea.vmem %s1291_s11, 128  ;;  %s1005_s0 = smov [#allocation9]  }
  0x9c   : > { %p888_p13 = scmp.ne.s32.totalorder %s1291_s11, %s887_s16  ;;  %s891_s13 = sshll.u32 %s1005_s0, 4  ;;  %s892_s13 = int_to_ptr.vmem [resolvable:$false] %s891_s13 }
  0x9d   : > { %s893_s29 = scalar_lea.vmem %s892_s13, 256  ;;  %p894_p12 = scmp.lt.s32.totalorder %s1291_s11, %s892_s13 }
  0x9e   : > { %p889_p4 = pnand %p888_p13, %p1374_p2  ;;  %p895_p0 = scmp.lt.s32.totalorder %s893_s29, %s887_s16 }
  0xa0   : > { %p890_p6 = pneg %p889_p4  ;;  %p896_p3 = por %p895_p0, %p894_p12 }
  0xa2   : > { %p897_p5 = pnand %p896_p3, %p890_p6 }
  0xa4   : > { %900 = shalt.err (!%p897_p5)
}
  0xa5   : > { %s901_s6 = scalar_lea.hbm %s1288_s27, 128  ;;  %s905_s7 = scalar_lea.hbm %s1352_s5, 256 }
  0xa6   : > { %p902_p8 = scmp.ne.s32.totalorder %s1288_s27, %s901_s6  ;;  %p906_p7 = scmp.lt.u32.totalorder %s1288_s27, %s1352_s5 }
  0xa7   : > { %p907_p9 = scmp.lt.u32.totalorder %s905_s7, %s901_s6  ;;  %p909_p13 = scmp.lt.u32.totalorder %s901_s6, %s1288_s27 }
  0xa8   : > { %p903_p11 = pnand %p902_p8, %p1374_p2 }
  0xa9   : > { %p908_p10 = por %p907_p9, %p906_p7 }
  0xaa   : > { %p904_p1 = pneg %p903_p11 }
  0xab   : > { %p910_p4 = por %p909_p13, %p908_p10 }
  0xad   : > { %p911_p6 = pnand %p910_p4, %p904_p1 }
  0xaf   : > { %914 = shalt.err (!%p911_p6)
}
  0xb0   : > { %676 = dma.vmem_to_hbm [thread:$0]  (%p1374_p2), %s1291_s11, 128, %s1288_s27, %s405_s21  }
  0xb1 PF: > { %s469_s30 = sand.u32 1, %s970_s18   ;;  %p1376_p12 = scmp.ne.s32.totalorder %s1365_s10, 0 }
  0xb2   : > { %p1377_p0 = scmp.ge.s32.totalorder %s998_s25, 2  ;;  %s470_s26 = scalar_lea.sflag [#allocation4], %s469_s30 }
  0xb4   : > { %p686_p3 = pnand %p1377_p0, %p1376_p12 }
  0xb6   : > { %956 = dma.done.wait (!%p686_p3), %s470_s26, 128  }
  0xb7   : > { %958 = vsyncadd (!%p686_p3), %s470_s26, 4294967168  ;;  %s1378_s28 = sadd.s32 4294967294, %s998_s25  }
  0xb8   : > { %s478_s12 = sand.u32 1, %s1378_s28  }
  0xb9   : > { %s479_s14 = scalar_lea.sflag [#allocation7], %s478_s12 }
  0xba   : > { %960 = dma.done.wait (!%p686_p3), %s479_s14, 256  }
  0xbb   : > { %962 = vsyncadd (!%p686_p3), %s479_s14, 4294967040  ;;  %s497_s9 = scalar_lea.sflag [#allocation10], %s469_s30 }
  0xbc   : > { %964 = dma.done.wait (!%p686_p3), %s497_s9, 128  }
  0xbd   : > { %966 = vsyncadd (!%p686_p3), %s497_s9, 4294967168  ;;  %s28_s25 = sadd.s32 1, %s998_s25   ;;  %s1379_s10 = sld [smem:[#allocation15_spill]] }
  0xbe   : > { %p25_p2 = scmp.ge.s32.totalorder %s28_s25, 4   ;;  %s1380_s18 = smov %s974_s19 }
  0xbf   : > { %s1381_s19 = smov %s978_s20  ;;  %s1382_s20 = smov %s1097_s8 }
  0xc0   : > { %s1383_s21 = smov %s986_s22  ;;  %s1337_s22 = smov 0  }
  0xc1   : > { %s1384_s23 = smov %s994_s24  ;;  %27 = sbr.rel (!%p25_p2) target bundleno = 14 (0xe), region = 129 }
  0xc3   : > { %s1385_s24 = smov %s1379_s10 }
  0xc8   :  { %502 = vsyncpa [#allocation3], 1 }
  0xc9   :  { %504 = vsyncpa [#allocation3 + $0x1], 1 }
  0xca   :  { %505 = vsyncpa [#allocation4], 1 }
  0xcb   :  { %507 = vsyncpa [#allocation4 + $0x1], 1 }
  0xcc   :  { %508 = vsyncpa [#allocation7], 1 }
  0xcd   :  { %510 = vsyncpa [#allocation7 + $0x1], 1 }
  0xce   :  { %511 = vsyncpa [#allocation10], 1 }
  0xcf   :  { %513 = vsyncpa [#allocation10 + $0x1], 1 }

</bundles_post_ra>
